<compile_context>
chip_gen: v7x
topology: tpu7x:2x2x1
jax: 0.10.0
libtpu: 0.0.40
codegen_flags: <defaults>
</compile_context>

<pallas_src>
import jax
import jax.numpy as jnp
from jax.experimental import pallas as pl
from jax.experimental.pallas import tpu as pltpu

_MAX_BLOCK_BYTES = 4 * 1024 * 1024          # per (nb, C, TP) block budget
_VMEM_LIMIT_BYTES = 32 * 1024 * 1024        # explicit scoped-VMEM override


def _round_up(x, m):
    return (x + m - 1) // m * m


def _pick_tiling(n, c, p, itemsize):
    """Choose (nb, tp): batch-fold factor and lane-dense pixel tile width."""
    # Fold the whole (small) batch into one block so per-step DMAs stay large.
    nb = n if (n <= 8 and n * c * 128 * itemsize <= _MAX_BLOCK_BYTES) else 1

    if p <= 128:
        tp = p                                       # full-extent block (always legal)
    else:
        per_lane = max(1, nb * c * itemsize)
        cap = max(128, (_MAX_BLOCK_BYTES // per_lane) // 128 * 128)
        tp = min(cap, _round_up(p, 128))             # lane-dense, multiple of 128

    # v7x megacore: keep >= 2 grid steps when the image would fit in one tile.
    n_blocks = -(-n // nb)
    p_blocks = -(-p // tp)
    if n_blocks * p_blocks < 2 and p > 256:
        tp = max(128, _round_up(-(-p // 2), 128))
    return nb, tp


def _conv1x1_prelu_kernel(x_ref, w_ref, b_ref, a_ref, o_ref):
    # x_ref: (nb, C, TP)  -- channels on sublanes, pixels lane-dense
    # w_ref: (C, C)       -- conv weight (rows already permuted to shuffle order)
    # b_ref: (C, 1) f32   -- conv bias
    # a_ref: (C, 1) f32   -- PReLU alpha (broadcast of the shared scalar)
    # o_ref: (nb, C, TP)
    w = w_ref[...]
    b = b_ref[...]
    a = a_ref[...]
    for i in range(x_ref.shape[0]):                   # static, small (nb <= 8)
        y = jnp.dot(w, x_ref[i], preferred_element_type=jnp.float32)  # (C, TP) f32
        y = y + b                                      # bias, broadcast over lanes
        y = jnp.where(y >= 0.0, y, a * y)              # PReLU on f32 accumulator
        o_ref[i] = y.astype(o_ref.dtype)


def conv1x1_prelu(x_ncp, w2d, bias_c1, alpha_c1, *, nb, tp):
    """x_ncp: (N, C, P); w2d: (C, C); bias_c1/alpha_c1: (C, 1) f32."""
    n, c, p = x_ncp.shape
    grid = (pl.cdiv(n, nb), pl.cdiv(p, tp))
    return pl.pallas_call(
        _conv1x1_prelu_kernel,
        out_shape=jax.ShapeDtypeStruct((n, c, p), x_ncp.dtype),
        grid_spec=pltpu.PrefetchScalarGridSpec(
            num_scalar_prefetch=0,
            grid=grid,
            in_specs=[
                pl.BlockSpec((nb, c, tp), lambda i, j: (i, 0, j)),   # x tile
                pl.BlockSpec((c, c), lambda i, j: (0, 0)),           # weight (resident)
                pl.BlockSpec((c, 1), lambda i, j: (0, 0)),           # bias (resident)
                pl.BlockSpec((c, 1), lambda i, j: (0, 0)),           # alpha (resident)
            ],
            out_specs=pl.BlockSpec((nb, c, tp), lambda i, j: (i, 0, j)),
        ),
        compiler_params=pltpu.CompilerParams(
            dimension_semantics=("parallel", "parallel"),
            vmem_limit_bytes=_VMEM_LIMIT_BYTES,
        ),
    )(x_ncp, w2d, bias_c1, alpha_c1)


def _shuffle_perm(c):
    """Kernel output channel k -> original conv output channel.

    Order k = r1 * (2*c_out) + r2 * c_out + co, i.e. channels grouped so the
    post-kernel data movement is a single reshape/transpose.
    """
    c_out = c // 4
    return [co * 4 + r1 * 2 + r2
            for r1 in range(2) for r2 in range(2) for co in range(c_out)]


def up_forward(x_nchw, conv_w, conv_b, prelu_alpha):
    """Full _up.forward.  x_nchw: (N, C, H, W); conv_w: (C, C, 1, 1)."""
    n, c, h, w = x_nchw.shape
    assert c % 4 == 0, "PixelShuffle(2) needs channels divisible by 4"
    c_out = c // 4
    p = h * w
    dtype = x_nchw.dtype
    itemsize = jnp.dtype(dtype).itemsize

    nb, tp = _pick_tiling(n, c, p, itemsize)

    # NCHW viewed as (N, C, H*W): free reshape, channels stay on sublanes.
    x_flat = x_nchw.reshape(n, c, p)

    # Permute conv rows so the kernel emits channels already in shuffle order.
    perm = jnp.array(_shuffle_perm(c), dtype=jnp.int32)
    w2d = conv_w[perm, :, 0, 0].astype(dtype)                    # (C, C)
    bias = conv_b[perm].reshape(c, 1).astype(jnp.float32)        # (C, 1)

    alpha = jnp.asarray(prelu_alpha, jnp.float32).reshape(-1)
    if alpha.shape[0] == 1:
        alpha_c = jnp.broadcast_to(alpha, (c,))                  # nn.PReLU() default
    elif alpha.shape[0] == c:
        alpha_c = alpha[perm]                                    # per-channel PReLU
    else:
        raise ValueError("prelu_alpha must have 1 or C elements")
    alpha_c1 = alpha_c.reshape(c, 1)

    y_flat = conv1x1_prelu(x_flat, w2d, bias, alpha_c1, nb=nb, tp=tp)

    # PixelShuffle(2): channel regroup already done by the row permutation,
    # so only one fused reshape/transpose remains (the W lane interleave).
    y6 = y_flat.reshape(n, 2, 2, c_out, h, w)                    # (n, r1, r2, co, h, w)
    out = jnp.transpose(y6, (0, 3, 4, 1, 5, 2))                  # (n, co, h, r1, w, r2)
    return out.reshape(n, c_out, 2 * h, 2 * w)


def _pixel_shuffle_ref(x, r=2):
    """PyTorch nn.PixelShuffle semantics on NCHW input (reference path)."""
    n, c, h, w = x.shape
    c_out = c // (r * r)
    x = x.reshape(n, c_out, r, r, h, w)
    x = jnp.transpose(x, (0, 1, 4, 2, 5, 3))
    return x.reshape(n, c_out, h * r, w * r)


def reference_forward(x_nchw, conv_w, conv_b, prelu_alpha):
    """Pure-JAX reference matching the PyTorch module (un-permuted weights)."""
    y = (jnp.einsum("nchw,oc->nohw", x_nchw, conv_w[:, :, 0, 0])
         + conv_b[None, :, None, None])
    y = jnp.where(y >= 0, y, prelu_alpha * y)
    return _pixel_shuffle_ref(y, r=2)


if __name__ == "__main__":
    # Small shapes consistent with the module: channel_in must be divisible by 4.
    N, C, H, W = 2, 8, 16, 16

    key = jax.random.PRNGKey(0)
    kx, kw, kb = jax.random.split(key, 3)

    # Snap test data to bf16-representable values so the kernel-vs-reference
    # comparison is insensitive to MXU input-rounding differences.
    def _snap(a):
        return a.astype(jnp.bfloat16).astype(jnp.float32)

    x = _snap(jax.random.normal(kx, (N, C, H, W), dtype=jnp.float32))
    conv_w = _snap(jax.random.normal(kw, (C, C, 1, 1), dtype=jnp.float32) * 0.1)
    conv_b = _snap(jax.random.normal(kb, (C,), dtype=jnp.float32) * 0.1)
    prelu_alpha = jnp.float32(0.25)   # nn.PReLU() default (single shared alpha)

    up = jax.jit(up_forward)
    out = jax.block_until_ready(up(x, conv_w, conv_b, prelu_alpha))
    ref = reference_forward(x, conv_w, conv_b, prelu_alpha)

    assert out.shape == (N, C // 4, 2 * H, 2 * W), out.shape
    assert jnp.allclose(out, ref, atol=1e-4, rtol=1e-4), float(
        jnp.max(jnp.abs(out - ref)))

    print("KERNEL_OK")
</pallas_src>

<mosaic_0001>
module attributes {stable_mosaic.version = 11 : i64} {
  func.func @_conv1x1_prelu_kernel(%arg0: i32, %arg1: i32, %arg2: memref<2x8x256xf32, #tpu.memory_space<vmem>>, %arg3: memref<8x8xf32, #tpu.memory_space<vmem>>, %arg4: memref<8x1xf32, #tpu.memory_space<vmem>>, %arg5: memref<8x1xf32, #tpu.memory_space<vmem>>, %arg6: memref<2x8x256xf32, #tpu.memory_space<vmem>>) attributes {dimension_semantics = [#tpu.dimension_semantics<parallel>, #tpu.dimension_semantics<parallel>], iteration_bounds = array<i64: 1, 1>, scalar_prefetch = 0 : i64, scratch_operands = 0 : i64, tpu.core_type = #tpu.core_type<tc>, window_params = [{transform_indices = @transform_0, window_bounds = array<i64: 2, 8, 256>}, {pipeline_mode = #tpu.pipeline_mode<synchronous>, transform_indices = @transform_1, window_bounds = array<i64: 8, 8>}, {pipeline_mode = #tpu.pipeline_mode<synchronous>, transform_indices = @transform_2, window_bounds = array<i64: 8, 1>}, {pipeline_mode = #tpu.pipeline_mode<synchronous>, transform_indices = @transform_3, window_bounds = array<i64: 8, 1>}, {transform_indices = @transform_4, window_bounds = array<i64: 2, 8, 256>}]} {
    %c0 = arith.constant 0 : index
    %c0_0 = arith.constant 0 : index
    %0 = vector.load %arg3[%c0, %c0_0] : memref<8x8xf32, #tpu.memory_space<vmem>>, vector<8x8xf32>
    %c0_1 = arith.constant 0 : index
    %c0_2 = arith.constant 0 : index
    %1 = vector.load %arg4[%c0_1, %c0_2] : memref<8x1xf32, #tpu.memory_space<vmem>>, vector<8x1xf32>
    %c0_3 = arith.constant 0 : index
    %c0_4 = arith.constant 0 : index
    %2 = vector.load %arg5[%c0_3, %c0_4] : memref<8x1xf32, #tpu.memory_space<vmem>>, vector<8x1xf32>
    %c0_5 = arith.constant 0 : index
    %c0_6 = arith.constant 0 : index
    %c0_7 = arith.constant 0 : index
    %3 = vector.load %arg2[%c0_5, %c0_6, %c0_7] : memref<2x8x256xf32, #tpu.memory_space<vmem>>, vector<1x8x256xf32>
    %4 = vector.shape_cast %3 : vector<1x8x256xf32> to vector<8x256xf32>
    %cst = arith.constant dense<0.000000e+00> : vector<8x256xf32>
    %5 = tpu.matmul %0, %4, %cst {dimension_numbers = #tpu.dot_dimension_numbers<[1], [0], [0], [1], [0, 0, 1, 1], [], []>} : vector<8x8xf32>, vector<8x256xf32>, vector<8x256xf32> -> vector<8x256xf32>
    %6 = vector.broadcast %1 : vector<8x1xf32> to vector<8x256xf32>
    %7 = arith.addf %5, %6 : vector<8x256xf32>
    %cst_8 = arith.constant 0.000000e+00 : f32
    %8 = vector.broadcast %cst_8 : f32 to vector<8x256xf32>
    %9 = arith.cmpf oge, %7, %8 : vector<8x256xf32>
    %10 = vector.broadcast %2 : vector<8x1xf32> to vector<8x256xf32>
    %11 = arith.mulf %10, %7 : vector<8x256xf32>
    %12 = arith.select %9, %7, %11 : vector<8x256xi1>, vector<8x256xf32>
    %c0_9 = arith.constant 0 : index
    %c0_10 = arith.constant 0 : index
    %c0_11 = arith.constant 0 : index
    %13 = vector.load %arg6[%c0_9, %c0_10, %c0_11] : memref<2x8x256xf32, #tpu.memory_space<vmem>>, vector<1x8x256xf32>
    %14 = vector.shape_cast %13 : vector<1x8x256xf32> to vector<8x256xf32>
    %15 = vector.shape_cast %12 : vector<8x256xf32> to vector<1x8x256xf32>
    tpu.vector_store %arg6[%c0_9, %c0_10, %c0_11], %15 {strides = array<i32>} : memref<2x8x256xf32, #tpu.memory_space<vmem>>, vector<1x8x256xf32>,
    %c1 = arith.constant 1 : index
    %c0_12 = arith.constant 0 : index
    %c0_13 = arith.constant 0 : index
    %16 = vector.load %arg2[%c1, %c0_12, %c0_13] : memref<2x8x256xf32, #tpu.memory_space<vmem>>, vector<1x8x256xf32>
    %17 = vector.shape_cast %16 : vector<1x8x256xf32> to vector<8x256xf32>
    %cst_14 = arith.constant dense<0.000000e+00> : vector<8x256xf32>
    %18 = tpu.matmul %0, %17, %cst_14 {dimension_numbers = #tpu.dot_dimension_numbers<[1], [0], [0], [1], [0, 0, 1, 1], [], []>} : vector<8x8xf32>, vector<8x256xf32>, vector<8x256xf32> -> vector<8x256xf32>
    %19 = vector.broadcast %1 : vector<8x1xf32> to vector<8x256xf32>
    %20 = arith.addf %18, %19 : vector<8x256xf32>
    %cst_15 = arith.constant 0.000000e+00 : f32
    %21 = vector.broadcast %cst_15 : f32 to vector<8x256xf32>
    %22 = arith.cmpf oge, %20, %21 : vector<8x256xf32>
    %23 = vector.broadcast %2 : vector<8x1xf32> to vector<8x256xf32>
    %24 = arith.mulf %23, %20 : vector<8x256xf32>
    %25 = arith.select %22, %20, %24 : vector<8x256xi1>, vector<8x256xf32>
    %c1_16 = arith.constant 1 : index
    %c0_17 = arith.constant 0 : index
    %c0_18 = arith.constant 0 : index
    %26 = vector.load %arg6[%c1_16, %c0_17, %c0_18] : memref<2x8x256xf32, #tpu.memory_space<vmem>>, vector<1x8x256xf32>
    %27 = vector.shape_cast %26 : vector<1x8x256xf32> to vector<8x256xf32>
    %28 = vector.shape_cast %25 : vector<8x256xf32> to vector<1x8x256xf32>
    tpu.vector_store %arg6[%c1_16, %c0_17, %c0_18], %28 {strides = array<i32>} : memref<2x8x256xf32, #tpu.memory_space<vmem>>, vector<1x8x256xf32>,
    return
  }
  func.func @transform_0(%arg0: i32, %arg1: i32) -> (i32, i32, i32) {
    %c0_i32 = arith.constant 0 : i32
    %c0_i32_0 = arith.constant 0 : i32
    return %arg0, %c0_i32, %arg1 : i32, i32, i32
  }
  func.func @transform_1(%arg0: i32, %arg1: i32) -> (i32, i32) {
    %c0_i32 = arith.constant 0 : i32
    %c0_i32_0 = arith.constant 0 : i32
    %c0_i32_1 = arith.constant 0 : i32
    return %c0_i32, %c0_i32_0 : i32, i32
  }
  func.func @transform_2(%arg0: i32, %arg1: i32) -> (i32, i32) {
    %c0_i32 = arith.constant 0 : i32
    %c0_i32_0 = arith.constant 0 : i32
    %c0_i32_1 = arith.constant 0 : i32
    return %c0_i32, %c0_i32_0 : i32, i32
  }
  func.func @transform_3(%arg0: i32, %arg1: i32) -> (i32, i32) {
    %c0_i32 = arith.constant 0 : i32
    %c0_i32_0 = arith.constant 0 : i32
    %c0_i32_1 = arith.constant 0 : i32
    return %c0_i32, %c0_i32_0 : i32, i32
  }
  func.func @transform_4(%arg0: i32, %arg1: i32) -> (i32, i32, i32) {
    %c0_i32 = arith.constant 0 : i32
    %c0_i32_0 = arith.constant 0 : i32
    return %arg0, %c0_i32, %arg1 : i32, i32, i32
  }
}

</mosaic_0001>

<bundles_post_ra>
// kernel: up_forward.1
= control target key start
LH: loop header
LB: loop body
LE: loop exit
PB: predicated region body
PF: predicated region fallthrough
CT: control target
= control target key end

     0   :  { %v211_v3 = vmov 0.0   ;;  %vm27_vm0 = vcmask 64512   ;;  %v212_v7 = vmov 0   ;;  %s271_s0 = inlined_call_operand.vmem [shape: f32[2,8,256], index: 0, kind: input, shape index: {}]   ;;  %s272_s1 = inlined_call_operand.vmem [shape: f32[8,8], index: 1, kind: input, shape index: {}]   ;;  %s273_s2 = inlined_call_operand.vmem [shape: f32[8,1], index: 2, kind: input, shape index: {}]   ;;  %s274_s3 = inlined_call_operand.vmem [shape: f32[8,1], index: 3, kind: input, shape index: {}]   ;;  %s275_s4 = inlined_call_operand.vmem [shape: f32[2,8,256], index: 4, kind: output, shape index: {}]  }
   0x1   :  { %v21_v0 = vld [vmem:[%s271_s0 + $0x8] sm:$0xff]  ;;  %v204_v1 = vld [vmem:[%s271_s0 + $0x18] sm:$0xff]  ;;  %v20_v2 = vld [vmem:[%s271_s0] sm:$0xff]  ;;  %95 = vmatprep.mubr.f32.mxu0 %v211_v3  ;;  %182 = vmatprep.mubr.f32.mxu1 %v211_v3 }
   0x2   :  { %31 = vmatprep.subr.mxu0 %v21_v0  ;;  %118 = vmatprep.subr.mxu1 %v204_v1  ;;  %v203_v4 = vld [vmem:[%s271_s0 + $0x10] sm:$0xff]  ;;  %v17_v5 = vld [vmem:[%s272_s1] sm:$0xff] }
   0x3   :  { %32 = vmatpush1.msra.mxu0 %v20_v2  ;;  %119 = vmatpush1.msra.mxu1 %v203_v4  ;;  %v18_v6 = vld [vmem:[%s273_s2] sm:$0xff] }
   0x4   :  { %202 = vmatmul.mubr.msk.f32.vlgmr.msra.gmra.mrb[0].mxu0 %vm27_vm0, %v17_v5  ;;  %205 = vmatmul.mubr.msk.f32.vlgmr.msra.gmra.mrb[0].mxu1 %vm27_vm0, %v17_v5  ;;  %v19_v8 = vld [vmem:[%s274_s3] sm:$0xff] }
   0x5   :  { %210 = vset.pattern.permute.xlu0 %v212_v7 }
   0x6   :  { %24 = vperm.xlu0 %210, %v18_v6  }
   0xa   :  { %106 = vperm.xlu0 %210, %v19_v8  }
  0x85   :  { %v25_v9 = vpop.permute.xlu0 %24 }
  0x89   :  { %v107_v16 = vpop.permute.xlu0 %106 }
  0xd7   :  { %v97_v10 = vpop.f32.mrb[0].mxu0  ;;  %v184_v11 = vpop.f32.mrb[0].mxu1 }
  0xd8   :  { %v98_v12 = vadd.f32 %v97_v10, %v25_v9  ;;  %v185_v13 = vadd.f32 %v184_v11, %v25_v9  ;;  %v99_v14 = vpop.f32.mrb[1].mxu0  ;;  %v186_v15 = vpop.f32.mrb[1].mxu1 }
  0xd9   :  { %v100_v17 = vadd.f32 %v99_v14, %v25_v9  ;;  %v187_v18 = vadd.f32 %v186_v15, %v25_v9 }
  0xda   :  { %vm102_vm1 = vcmp.ge.f32.partialorder %v98_v12, 0.0  ;;  %v109_v19 = vmul.f32 %v107_v16, %v98_v12  ;;  %vm189_vm2 = vcmp.ge.f32.partialorder %v185_v13, 0.0  ;;  %v191_v20 = vmul.f32 %v185_v13, %v107_v16 }
  0xdb   :  { %vm103_vm3 = vcmp.ge.f32.partialorder %v100_v17, 0.0  ;;  %v110_v21 = vmul.f32 %v107_v16, %v100_v17  ;;  %vm190_vm4 = vcmp.ge.f32.partialorder %v187_v18, 0.0  ;;  %v192_v22 = vmul.f32 %v187_v18, %v107_v16 }
  0xdc   :  { %v111_v23 = vsel %vm102_vm1, %v98_v12, %v109_v19  ;;  %v193_v24 = vsel %vm189_vm2, %v185_v13, %v191_v20 }
  0xdd   :  { %113 = vst [vmem:[%s275_s4] sm:$0xff] %v111_v23  ;;  %206 = vst [vmem:[%s275_s4 + $0x10] sm:$0xff] %v193_v24  ;;  %v112_v25 = vsel %vm103_vm3, %v100_v17, %v110_v21  ;;  %v194_v26 = vsel %vm190_vm4, %v187_v18, %v192_v22 }
  0xde   :  { %114 = vst [vmem:[%s275_s4 + $0x8] sm:$0xff] %v112_v25  ;;  %207 = vst [vmem:[%s275_s4 + $0x18] sm:$0xff] %v194_v26 }

</bundles_post_ra>
